<compile_context>
chip_gen: v6e
topology: v6e:2x2x1
jax: 0.10.0
libtpu: 0.0.40
codegen_flags: <defaults>
</compile_context>

<pallas_src>
import functools

import jax
import jax.numpy as jnp
from jax.experimental import pallas as pl
from jax.experimental.pallas import tpu as pltpu


def _weight_block_kernel(x_ref, w_ref, b_ref, o_ref, *, hw_true):
    # x_ref: (Bt, C, HWp)  feature tile, spatial flattened + lane-padded (VMEM)
    # w_ref: (2, C)        fc weight, torch nn.Linear layout (VMEM)
    # b_ref: (2,)          fc bias (SMEM)
    # o_ref: (Bt, C, HWp)
    x = x_ref[...]                                   # keep native dtype (bf16 stays bf16)
    bt, C, _ = x.shape

    # Global average pool over the true spatial extent (padding is zeros, so
    # summing the padded lanes is harmless); accumulate in f32.
    pooled = jnp.sum(x.astype(jnp.float32), axis=-1) * (1.0 / hw_true)     # (Bt, C)

    # fc(C -> 2) as a VPU elementwise-mul + lane reduction (no MXU fire,
    # no transpose); bias read as SMEM scalars.
    w0 = w_ref[0:1, :].astype(jnp.float32)                                 # (1, C)
    w1 = w_ref[1:2, :].astype(jnp.float32)                                 # (1, C)
    logit0 = jnp.sum(pooled * w0, axis=-1, keepdims=True) + b_ref[0]       # (Bt, 1)
    logit1 = jnp.sum(pooled * w1, axis=-1, keepdims=True) + b_ref[1]       # (Bt, 1)

    # sigmoid(relu(.))
    act0 = jax.nn.sigmoid(jnp.maximum(logit0, 0.0))                        # (Bt, 1)
    act1 = jax.nn.sigmoid(jnp.maximum(logit1, 0.0))                        # (Bt, 1)

    # First C/2 channels use act0, second half act1.
    ch = jax.lax.broadcasted_iota(jnp.int32, (C, 1), 0)                    # (C, 1)
    w_sel = jnp.where(ch < (C // 2), act0[:, :, None], act1[:, :, None])   # (Bt, C, 1)

    # Scale in the input dtype (halves vreg/HBM traffic for bf16 inputs).
    o_ref[...] = (x * w_sel.astype(x.dtype)).astype(o_ref.dtype)


def weight_block_forward(feature, fc_w, fc_b, *, block_budget_bytes=8 * 1024 * 1024):
    """feature: (B, C, H, W) NCHW; fc_w: (2, C) torch layout; fc_b: (2,)."""
    B, C, H, W = feature.shape
    assert C % 2 == 0, "weight_block assumes an even channel count"
    HW = H * W

    # Lane-dense last dim: pad the flattened spatial axis to a multiple of 128.
    HWp = ((HW + 127) // 128) * 128
    x = feature.reshape(B, C, HW)
    if HWp != HW:
        x = jnp.pad(x, ((0, 0), (0, 0), (0, HWp - HW)))

    # Batch-block to amortize per-grid-step overhead; keep block size (x ~4
    # double-buffering factor) within the VMEM budget on all generations.
    per_batch_bytes = C * HWp * x.dtype.itemsize
    bt = int(max(1, min(B, block_budget_bytes // max(per_batch_bytes, 1))))
    while B % bt != 0:
        bt -= 1
    # TODO(synk): if a single batch element's (C, HWp) slab exceeds the VMEM
    # budget (huge feature maps on v7x), split into a pool+fc kernel plus an
    # HW-tiled scale kernel instead of one fused pass.

    grid = (B // bt,)
    kernel = functools.partial(_weight_block_kernel, hw_true=HW)

    itemsize = x.dtype.itemsize
    cost = pl.CostEstimate(
        flops=3 * B * C * HW + 4 * B * C,
        transcendentals=2 * B,
        bytes_accessed=2 * B * C * HWp * itemsize + (2 * C + 2) * 4,
    )

    out = pl.pallas_call(
        kernel,
        out_shape=jax.ShapeDtypeStruct((B, C, HWp), feature.dtype),
        grid_spec=pltpu.PrefetchScalarGridSpec(
            num_scalar_prefetch=0,
            grid=grid,
            in_specs=[
                pl.BlockSpec((bt, C, HWp), lambda b: (b, 0, 0)),
                pl.BlockSpec((2, C), lambda b: (0, 0)),
                pl.BlockSpec(memory_space=pltpu.MemorySpace.SMEM),
            ],
            out_specs=pl.BlockSpec((bt, C, HWp), lambda b: (b, 0, 0)),
        ),
        compiler_params=pltpu.CompilerParams(
            dimension_semantics=("parallel",),
            vmem_limit_bytes=56 * 1024 * 1024,
        ),
        cost_estimate=cost,
    )(x, fc_w, fc_b)

    if HWp != HW:
        out = out[:, :, :HW]
    return out.reshape(B, C, H, W)


def weight_block_reference(feature, fc_w, fc_b):
    """Pure-JAX reference matching the PyTorch forward (fc_w in (2, C) layout)."""
    B, C, H, W = feature.shape
    pooled = jnp.mean(feature, axis=(2, 3))                 # (B, C)
    logits = pooled @ fc_w.T + fc_b                         # (B, 2)
    w = jax.nn.sigmoid(jnp.maximum(logits, 0.0))            # (B, 2)
    half = C // 2
    weights = jnp.concatenate(
        [jnp.tile(w[:, 0:1], (1, half)), jnp.tile(w[:, 1:2], (1, half))],
        axis=1)                                             # (B, C)
    return feature * weights[:, :, None, None]


if __name__ == "__main__":
    key = jax.random.PRNGKey(0)
    k_feat, k_w, k_b = jax.random.split(key, 3)

    B, C, H, W = 2, 4, 16, 16
    feature = jax.random.normal(k_feat, (B, C, H, W), dtype=jnp.float32)

    # nn.Linear(channel, 2): weight (2, C), bias (2,) — kept in torch layout.
    bound = 1.0 / (C ** 0.5)
    fc_w = jax.random.uniform(k_w, (2, C), jnp.float32, -bound, bound)
    fc_b = jax.random.uniform(k_b, (2,), jnp.float32, -bound, bound)

    out = weight_block_forward(feature, fc_w, fc_b)
    out = jax.block_until_ready(out)

    ref = weight_block_reference(feature, fc_w, fc_b)
    assert jnp.allclose(out, ref, atol=1e-5, rtol=1e-5), "mismatch vs reference"

    print("KERNEL_OK")
</pallas_src>

<mosaic_0001>
module attributes {stable_mosaic.version = 11 : i64} {
  func.func @_weight_block_kernel(%arg0: i32, %arg1: memref<2x4x256xf32, #tpu.memory_space<vmem>>, %arg2: memref<2x4xf32, #tpu.memory_space<vmem>>, %arg3: memref<2xf32, #tpu.memory_space<smem>>, %arg4: memref<2x4x256xf32, #tpu.memory_space<vmem>>) attributes {dimension_semantics = [#tpu.dimension_semantics<parallel>], iteration_bounds = array<i64: 1>, scalar_prefetch = 0 : i64, scratch_operands = 0 : i64, tpu.core_type = #tpu.core_type<tc>, window_params = [{transform_indices = @transform_0, window_bounds = array<i64: 2, 4, 256>}, {pipeline_mode = #tpu.pipeline_mode<synchronous>, transform_indices = @transform_1, window_bounds = array<i64: 2, 4>}, {transform_indices = @transform_2, window_bounds = array<i64: 2>}, {transform_indices = @transform_3, window_bounds = array<i64: 2, 4, 256>}]} {
    %c0 = arith.constant 0 : index
    %c0_0 = arith.constant 0 : index
    %c0_1 = arith.constant 0 : index
    %0 = vector.load %arg1[%c0, %c0_0, %c0_1] : memref<2x4x256xf32, #tpu.memory_space<vmem>>, vector<2x4x256xf32>
    %cst = arith.constant dense<0.000000e+00> : vector<2x4xf32>
    %1 = vector.multi_reduction <add>, %0, %cst [2] : vector<2x4x256xf32> to vector<2x4xf32>
    %cst_2 = arith.constant 3.906250e-03 : f32
    %2 = vector.broadcast %cst_2 : f32 to vector<2x4xf32>
    %3 = arith.mulf %1, %2 : vector<2x4xf32>
    %c0_3 = arith.constant 0 : index
    %c0_4 = arith.constant 0 : index
    %4 = vector.load %arg2[%c0_3, %c0_4] : memref<2x4xf32, #tpu.memory_space<vmem>>, vector<1x4xf32>
    %c1 = arith.constant 1 : index
    %c0_5 = arith.constant 0 : index
    %5 = vector.load %arg2[%c1, %c0_5] : memref<2x4xf32, #tpu.memory_space<vmem>>, vector<1x4xf32>
    %6 = vector.broadcast %4 : vector<1x4xf32> to vector<2x4xf32>
    %7 = arith.mulf %3, %6 : vector<2x4xf32>
    %cst_6 = arith.constant dense<0.000000e+00> : vector<2xf32>
    %8 = vector.multi_reduction <add>, %7, %cst_6 [1] : vector<2x4xf32> to vector<2xf32>
    %9 = vector.shape_cast %8 : vector<2xf32> to vector<2x1xf32>
    %c0_7 = arith.constant 0 : index
    %10 = memref.load %arg3[%c0_7] : memref<2xf32, #tpu.memory_space<smem>>
    %11 = vector.broadcast %10 : f32 to vector<2x1xf32>
    %12 = arith.addf %9, %11 : vector<2x1xf32>
    %13 = vector.broadcast %5 : vector<1x4xf32> to vector<2x4xf32>
    %14 = arith.mulf %3, %13 : vector<2x4xf32>
    %cst_8 = arith.constant dense<0.000000e+00> : vector<2xf32>
    %15 = vector.multi_reduction <add>, %14, %cst_8 [1] : vector<2x4xf32> to vector<2xf32>
    %16 = vector.shape_cast %15 : vector<2xf32> to vector<2x1xf32>
    %c1_9 = arith.constant 1 : index
    %17 = memref.load %arg3[%c1_9] : memref<2xf32, #tpu.memory_space<smem>>
    %18 = vector.broadcast %17 : f32 to vector<2x1xf32>
    %19 = arith.addf %16, %18 : vector<2x1xf32>
    %cst_10 = arith.constant 0.000000e+00 : f32
    %20 = vector.broadcast %cst_10 : f32 to vector<2x1xf32>
    %21 = arith.maximumf %12, %20 : vector<2x1xf32>
    %22 = arith.negf %21 : vector<2x1xf32>
    %23 = math.exp %22 : vector<2x1xf32>
    %cst_11 = arith.constant 1.000000e+00 : f32
    %24 = vector.broadcast %cst_11 : f32 to vector<2x1xf32>
    %25 = arith.addf %24, %23 : vector<2x1xf32>
    %26 = arith.divf %24, %25 : vector<2x1xf32>
    %cst_12 = arith.constant 0.000000e+00 : f32
    %27 = vector.broadcast %cst_12 : f32 to vector<2x1xf32>
    %28 = arith.maximumf %19, %27 : vector<2x1xf32>
    %29 = arith.negf %28 : vector<2x1xf32>
    %30 = math.exp %29 : vector<2x1xf32>
    %cst_13 = arith.constant 1.000000e+00 : f32
    %31 = vector.broadcast %cst_13 : f32 to vector<2x1xf32>
    %32 = arith.addf %31, %30 : vector<2x1xf32>
    %33 = arith.divf %31, %32 : vector<2x1xf32>
    %34 = tpu.iota {dimensions = array<i32: 0>} : vector<4x1xi32>
    %c2_i32 = arith.constant 2 : i32
    %35 = vector.broadcast %c2_i32 : i32 to vector<4x1xi32>
    %36 = arith.cmpi slt, %34, %35 : vector<4x1xi32>
    %37 = vector.shape_cast %26 : vector<2x1xf32> to vector<2x1x1xf32>
    %38 = vector.shape_cast %33 : vector<2x1xf32> to vector<2x1x1xf32>
    %39 = vector.shape_cast %36 : vector<4x1xi1> to vector<1x4x1xi1>
    %40 = vector.broadcast %39 : vector<1x4x1xi1> to vector<2x4x1xi1>
    %41 = vector.shape_cast %37 : vector<2x1x1xf32> to vector<2x1x1xf32>
    %42 = vector.broadcast %41 : vector<2x1x1xf32> to vector<2x4x1xf32>
    %43 = vector.shape_cast %38 : vector<2x1x1xf32> to vector<2x1x1xf32>
    %44 = vector.broadcast %43 : vector<2x1x1xf32> to vector<2x4x1xf32>
    %45 = arith.select %40, %42, %44 : vector<2x4x1xi1>, vector<2x4x1xf32>
    %46 = vector.broadcast %45 : vector<2x4x1xf32> to vector<2x4x256xf32>
    %47 = arith.mulf %0, %46 : vector<2x4x256xf32>
    %c0_14 = arith.constant 0 : index
    %c0_15 = arith.constant 0 : index
    %c0_16 = arith.constant 0 : index
    %48 = vector.load %arg4[%c0_14, %c0_15, %c0_16] : memref<2x4x256xf32, #tpu.memory_space<vmem>>, vector<2x4x256xf32>
    tpu.vector_store %arg4[%c0_14, %c0_15, %c0_16], %47 {strides = array<i32>} : memref<2x4x256xf32, #tpu.memory_space<vmem>>, vector<2x4x256xf32>,
    return
  }
  func.func @transform_0(%arg0: i32) -> (i32, i32, i32) {
    %c0_i32 = arith.constant 0 : i32
    %c0_i32_0 = arith.constant 0 : i32
    %c0_i32_1 = arith.constant 0 : i32
    return %arg0, %c0_i32, %c0_i32_0 : i32, i32, i32
  }
  func.func @transform_1(%arg0: i32) -> (i32, i32) {
    %c0_i32 = arith.constant 0 : i32
    %c0_i32_0 = arith.constant 0 : i32
    %c0_i32_1 = arith.constant 0 : i32
    return %c0_i32, %c0_i32_0 : i32, i32
  }
  func.func @transform_2(%arg0: i32) -> i32 {
    %c0_i32 = arith.constant 0 : i32
    %c0_i32_0 = arith.constant 0 : i32
    return %c0_i32 : i32
  }
  func.func @transform_3(%arg0: i32) -> (i32, i32, i32) {
    %c0_i32 = arith.constant 0 : i32
    %c0_i32_0 = arith.constant 0 : i32
    %c0_i32_1 = arith.constant 0 : i32
    return %arg0, %c0_i32, %c0_i32_0 : i32, i32, i32
  }
}

</mosaic_0001>

<bundles_post_ra>
// kernel: tpu_custom_call.1
= control target key start
LH: loop header
LB: loop body
LE: loop exit
PB: predicated region body
PF: predicated region fallthrough
CT: control target
= control target key end

     0   :  { %8 = vsyncpa [#allocation3], 0  ;;  %s398_s0 = inlined_call_operand.hbm [shape: f32[2,4,256], index: 0, kind: input, shape index: {}]   ;;  %s399_s1 = inlined_call_operand.hbm [shape: f32[2,4], index: 1, kind: input, shape index: {}]   ;;  %s400_s2 = inlined_call_operand.vmem [shape: f32[2], index: 2, kind: input, shape index: {}]   ;;  %s401_s3 = inlined_call_operand.hbm [shape: f32[2,4,256], index: 3, kind: output, shape index: {}]  }
   0x1   :  { %9 = vsyncpa [#allocation7], 0 }
   0x2   :  { %10 = vsyncpa [#allocation5], 0 }
   0x3   :  { %11 = vsyncpa [#allocation4], 0  ;;  %s340_s12 = smov [#allocation2]  }
   0x4   :  { %s17_s13 = sshll.u32 %s340_s12, 4  ;;  %s18_s13 = int_to_ptr.vmem [resolvable:$true] %s17_s13 }
   0x5   :  { %s268_s14 = scalar_lea.vmem %s18_s13, 256  ;;  %p273_p1 = scmp.lt.s32.totalorder %s18_s13, %s18_s13 }
   0x6   :  { %p269_p0 = scmp.ne.s32.totalorder %s18_s13, %s268_s14  ;;  %p274_p2 = scmp.lt.s32.totalorder %s268_s14, %s268_s14 }
   0x8   :  { %p275_p3 = por %p274_p2, %p273_p1 }
   0xa   :  { %p276_p4 = pnand %p275_p3, %p269_p0 }
   0xc   :  { %279 = shalt.err (!%p276_p4)
}
   0xd   :  { %s341_s15 = smov 128   ;;  %s342_s16 = smov 8  }
   0xe   :  { %23 = dma.hbm_to_vmem [thread:$0]  %s398_s0, 256, %s18_s13, [#allocation3], %s341_s15, %s341_s15, %s342_s16  }
   0xf   :  { %s343_s19 = smov [#allocation6]   ;;  %s40_s23 = sshll.u32 %s400_s2, 4  ;;  %s41_s23 = int_to_ptr.vmem [resolvable:$true] %s40_s23 }
  0x10   :  { %s30_s20 = sshll.u32 %s343_s19, 4  ;;  %s31_s20 = int_to_ptr.vmem [resolvable:$true] %s30_s20 }
  0x11   :  { %s288_s24 = scalar_lea.vmem %s31_s20, 32  ;;  %p293_p6 = scmp.lt.s32.totalorder %s31_s20, %s31_s20 }
  0x12   :  { %p289_p5 = scmp.ne.s32.totalorder %s31_s20, %s288_s24  ;;  %p294_p7 = scmp.lt.s32.totalorder %s288_s24, %s288_s24 }
  0x14   :  { %p295_p8 = por %p294_p7, %p293_p6 }
  0x16   :  { %p296_p9 = pnand %p295_p8, %p289_p5 }
  0x18   :  { %299 = shalt.err (!%p296_p9)
}
  0x19   :  { %33 = dma.hbm_to_vmem [thread:$0]  %s399_s1, 32, %s31_s20, [#allocation7]  }
  0x1a   :  { %s300_s0 = scalar_lea.vmem %s41_s23, 16  ;;  %p305_p11 = scmp.lt.s32.totalorder %s41_s23, %s41_s23 }
  0x1b   :  { %p301_p10 = scmp.ne.s32.totalorder %s41_s23, %s300_s0  ;;  %p306_p12 = scmp.lt.s32.totalorder %s300_s0, %s300_s0 }
  0x1d   :  { %p307_p13 = por %p306_p12, %p305_p11 }
  0x1f   :  { %p308_p0 = pnand %p307_p13, %p301_p10 }
  0x21   :  { %311 = shalt.err (!%p308_p0)
}
  0x22   :  { %s344_s2 = smov [#allocation8]  }
  0x23   :  { %43 = dma.vmem_to_smem %s41_s23, 16, %s344_s2, [#allocation5]  }
  0x24   :  { %332 = dma.done.wait [#allocation3], 256  }
  0x25   :  { %333 = vsyncadd [#allocation3], 4294967040 }
  0x26   :  { %334 = dma.done.wait [#allocation7], 32  }
  0x27   :  { %335 = vsyncadd [#allocation7], 4294967264 }
  0x28   :  { %336 = dma.done.wait [#allocation5], 16  }
  0x29   :  { %337 = vsyncadd [#allocation5], 4294967280 }
  0x2a   :  { %53 = sfence }
  0x2b   :  { %v380_v0 = vld [vmem:[#allocation2] sm:$0xff]  ;;  %vm62_vm0 = vcmask 1043456   ;;  %v382_v1 = vld [vmem:[#allocation2 + $0x8] sm:$0xff]  ;;  %v235_v2 = vld [vmem:[#allocation6] ss:$0 sm:$0xff]  ;;  %v345_v12 = vmov 0   ;;  %v96_v23 = vlaneseq }
  0x2c   :  { %v58_v3 = vcombine.high %v380_v0, %v380_v0  ;;  %v63_v4 = vsel %vm62_vm0, %v380_v0, 0.0  ;;  %v59_v5 = vcombine.high %v382_v1, %v382_v1  ;;  %83 = vbcast.lane.b32.xlu1 %v235_v2, 256  ;;  %v236_v6 = vld [vmem:[#allocation6 + $0x1] ss:$0 sm:$0xff]  ;;  %v68_v8 = vsel %vm62_vm0, %v382_v1, 0.0  ;;  %248 = vset.pattern.permute.xlu0 %v345_v12  ;;  %s113_s1 = sld [smem:[#allocation8]] }
  0x2d   :  { %249 = vset.pattern.permute.xlu1 %v345_v12  ;;  %v97_v24 = vand.u32 127, %v96_v23  ;;  %v99_v25 = vshrl.u32 %v96_v23, 7  ;;  %vm106_vm1 = vcmask 1041409   ;;  %vm109_vm2 = vcmask 25600   ;;  %s237_s27 = sld [smem:[#allocation8 + $0x1]]  ;;  %s347_s28 = smov [#allocation9]  }
  0x2e   :  { %v64_v7 = vsel %vm62_vm0, %v58_v3, 0.0  ;;  %v69_v9 = vsel %vm62_vm0, %v59_v5, 0.0  ;;  %v346_v53 = vmov 839922192   ;;  %s221_s29 = sshll.u32 %s347_s28, 4  ;;  %s222_s29 = int_to_ptr.vmem [resolvable:$true] %s221_s29 }
  0x2f   :  { %v65_v10 = vadd.f32 %v64_v7, %v63_v4  ;;  %v70_v11 = vadd.f32 %v69_v9, %v68_v8  ;;  %v100_v26 = vsub.s32 %v97_v24, %v99_v25  ;;  %v197_v54 = vunpack.c.l.s4 %v346_v53  ;;  %s312_s30 = scalar_lea.vmem %s222_s29, 256  ;;  %p317_p2 = scmp.lt.s32.totalorder %s222_s29, %s222_s29 }
  0x30   :  { %122 = vbcast.lane.b32.xlu1 %v236_v6, 256  ;;  %v171_v56 = vsub.s32 0, %v99_v25  ;;  %v175_v57 = vsub.s32 1, %v99_v25  ;;  %vm167_vm3 = vcmp.lt.s32.totalorder %v99_v25, 2  ;;  %p313_p1 = scmp.ne.s32.totalorder %s222_s29, %s312_s30  ;;  %p318_p3 = scmp.lt.s32.totalorder %s312_s30, %s312_s30 }
  0x31   :  { %66 = vadd.xlane.f32.xlu0 %v65_v10  ;;  %v198_v55 = vunpack.c.0.s8 %v197_v54 }
  0x32   :  { %v114_v39 = vstv %s113_s1  ;;  %p319_p4 = por %p318_p3, %p317_p2 }
  0x33   :  { %v149_v44 = vstv %s237_s27  ;;  %v201_v60 = vsub.s32 %v198_v55, %v99_v25 }
  0x34   :  { %p320_p5 = pnand %p319_p4, %p313_p1 }
  0x35   :  { %71 = vadd.xlane.f32.xlu0 %v70_v11 }
  0x9e   :  { %v84_v15 = vpop.permute.xlu1 %83 }
  0xa2   :  { %v123_v20 = vpop.permute.xlu1 %122 }
  0xba   :  { %v67_v13 = vpop.xlane.xlu0 %66 }
  0xbb   :  { %v73_v14 = vmul.f32 0.00390625, %v67_v13 }
  0xbd   :  { %v86_v16 = vmul.f32 %v84_v15, %v73_v14  ;;  %v125_v21 = vmul.f32 %v123_v20, %v73_v14 }
  0xbe   :  { %v72_v17 = vpop.xlane.xlu0 %71 }
  0xbf   :  { %v74_v18 = vmul.f32 0.00390625, %v72_v17  ;;  %91 = vperm.xlu0 %248, %v86_v16  }
  0xc1   :  { %v87_v19 = vmul.f32 %v84_v15, %v74_v18  ;;  %v126_v22 = vmul.f32 %v123_v20, %v74_v18 }
  0xc3   :  { %94 = vperm.xlu1 %249, %v87_v19  }
  0xc7   :  { %130 = vperm.xlu1 %249, %v125_v21  }
  0xcb   :  { %133 = vperm.xlu1 %249, %v126_v22  }
 0x13a   :  { %v92_v27 = vpop.permute.xlu0 %91 }
 0x13b   :  { %v101_v29 = vrot.slane %v92_v27, %v100_v26 }
 0x13e   :  { %v95_v28 = vpop.permute.xlu1 %94 }
 0x13f   :  { %v105_v30 = vrot.slane %v95_v28, %v100_v26 }
 0x141   :  { %v107_v31 = vsel %vm106_vm1, %v105_v30, %v101_v29 }
 0x142   :  { %v131_v32 = vpop.permute.xlu1 %130  ;;  %v110_v33 = vsel %vm109_vm2, %v107_v31, 0.0 }
 0x143   :  { %111 = vadd.xlane.f32.xlu1 %v110_v33  ;;  %v138_v35 = vrot.slane %v131_v32, %v100_v26 }
 0x146   :  { %v134_v34 = vpop.permute.xlu1 %133 }
 0x147   :  { %v142_v36 = vrot.slane %v134_v34, %v100_v26 }
 0x149   :  { %v143_v37 = vsel %vm106_vm1, %v142_v36, %v138_v35 }
 0x14a   :  { %v145_v38 = vsel %vm109_vm2, %v143_v37, 0.0 }
 0x14b   :  { %146 = vadd.xlane.f32.xlu0 %v145_v38 }
 0x1cc   :  { %v112_v40 = vpop.xlane.xlu1 %111 }
 0x1cd   :  { %v115_v41 = vadd.f32 %v114_v39, %v112_v40 }
 0x1cf   :  { %v151_v42 = vmax.f32 %v115_v41, 0.0 }
 0x1d1   :  { %v238_v43 = vmul.f32 -1.442695, %v151_v42 }
 0x1d3   :  { %252 = vpow2.f32 %v238_v43 }
 0x1d4   :  { %v147_v45 = vpop.xlane.xlu0 %146 }
 0x1d5   :  { %v150_v46 = vadd.f32 %v149_v44, %v147_v45 }
 0x1d7   :  { %v158_v47 = vmax.f32 %v150_v46, 0.0 }
 0x1d9   :  { %v239_v48 = vmul.f32 -1.442695, %v158_v47 }
 0x1db   :  { %254 = vpow2.f32 %v239_v48 }
 0x1e0   :  { %v253_v49 = vpop.eup %252 }
 0x1e1   :  { %v155_v50 = vadd.f32 1.0, %v253_v49 }
 0x1e3   :  { %256 = vrcp.f32 %v155_v50 }
 0x1e8   :  { %v255_v51 = vpop.eup %254 }
 0x1e9   :  { %v162_v52 = vadd.f32 1.0, %v255_v51 }
 0x1eb   :  { %258 = vrcp.f32 %v162_v52 }
 0x1f0   :  { %v257_v58 = vpop.eup %256 }
 0x1f1   :  { %v172_v61 = vrot.slane %v257_v58, %v171_v56  ;;  %v176_v62 = vrot.slane %v257_v58, %v175_v57 }
 0x1f8   :  { %v259_v59 = vpop.eup %258 }
 0x1f9   :  { %v183_v63 = vrot.slane %v259_v59, %v171_v56  ;;  %v187_v2 = vrot.slane %v259_v59, %v175_v57 }
 0x1fb   :  { %v192_v3 = vsel %vm167_vm3, %v172_v61, %v183_v63  ;;  %v193_v4 = vsel %vm167_vm3, %v176_v62, %v187_v2 }
 0x1fc   :  { %v202_v5 = vrot.slane %v192_v3, %v201_v60  ;;  %v209_v6 = vrot.slane %v193_v4, %v201_v60 }
 0x1fe   :  { %v212_v7 = vmul.f32 %v202_v5, %v380_v0  ;;  %v213_v8 = vmul.f32 %v209_v6, %v382_v1 }
 0x200   :  { %214 = vst [vmem:[#allocation9] sm:$0xff] %v212_v7  ;;  %215 = vst [vmem:[#allocation9 + $0x8] sm:$0xff] %v213_v8 }
 0x201   :  { %323 = shalt.err (!%p320_p5)
}
 0x202   :  { %227 = dma.vmem_to_hbm [thread:$0]  %s222_s29, 256, %s401_s3, [#allocation4], %s341_s15, %s341_s15, %s342_s16  }
 0x203   :  { %338 = dma.done.wait [#allocation4], 256  }
 0x204   :  { %339 = vsyncadd [#allocation4], 4294967040 }
 0x205   :  { %231 = vsyncpa [#allocation3], 1 }
 0x206   :  { %232 = vsyncpa [#allocation7], 1 }
 0x207   :  { %233 = vsyncpa [#allocation4], 1 }
 0x208   :  { %234 = vsyncpa [#allocation5], 1 }

</bundles_post_ra>
